<compile_context>
chip_gen: v5e
topology: v5e:2x2
jax: 0.10.0
libtpu: 0.0.40
codegen_flags: <defaults>
</compile_context>

<pallas_src>
import jax
import jax.numpy as jnp
from jax.experimental import pallas as pl
from jax.experimental.pallas import tpu as pltpu


# ----------------------------- helpers ------------------------------------- #

def _round_up(x, m):
    return (x + m - 1) // m * m


def _nbytes(a):
    return a.size * jnp.dtype(a.dtype).itemsize


def _device_kind():
    try:
        return jax.devices()[0].device_kind.lower()
    except Exception:
        return ""


def _num_tensorcores(kind):
    try:
        d = jax.devices()[0]
    except Exception:
        return 1
    n = getattr(d, "num_cores", None)
    if isinstance(n, int) and n >= 1:
        return n
    # Fallback heuristic: v7x has 2 TensorCores per chip.
    return 2 if "v7" in kind else 1


def _vmem_physical_bytes():
    try:
        return int(pltpu.get_tpu_info().vmem_capacity_bytes)
    except Exception:
        return 64 * 1024 * 1024  # conservative (v7x per-TC physical)


def _pick_batch_tiling(b, tb_max, num_cores):
    """Even batch tiles (<=tb_max, multiple of 8) with minimal padding.
    On multi-TC chips, round the tile count to a multiple of the core count so
    the 'parallel' grid axis actually shards across cores."""
    bp8 = _round_up(max(b, 8), 8)
    n_tiles = pl.cdiv(bp8, tb_max)
    if num_cores > 1 and bp8 >= 16 * num_cores:
        n_tiles = _round_up(n_tiles, num_cores)
    tb = _round_up(pl.cdiv(bp8, n_tiles), 8)
    bp = tb * n_tiles
    return bp, tb


# ------------------------------ kernel ------------------------------------- #

def _qmlp_kernel(x_ref, w1_ref, b1_ref, w2_ref, b2_ref, w3_ref, b3_ref, o_ref):
    # x: (tb, Dp); w1: (Dp, Hp); w2: (Hp, Hp); w3: (Hp, Ap); biases f32 (1, *);
    # o: (tb, Ap). Weights already in the compute dtype (f32 or bf16); only the
    # small per-tile activations are cast in-kernel. Accumulation is f32 on MXU.
    cdt = w1_ref.dtype
    x = x_ref[...].astype(cdt)

    h = jnp.dot(x, w1_ref[...], preferred_element_type=jnp.float32) + b1_ref[...]
    h = jnp.maximum(h, 0.0)

    h = jnp.dot(h.astype(cdt), w2_ref[...], preferred_element_type=jnp.float32) + b2_ref[...]
    h = jnp.maximum(h, 0.0)

    h = jnp.dot(h.astype(cdt), w3_ref[...], preferred_element_type=jnp.float32) + b3_ref[...]
    h = jnp.maximum(h, 0.0)   # forward() applies relu to fc3 output, per the spec

    o_ref[...] = h.astype(o_ref.dtype)


# --------------------------- params / wrapper ------------------------------ #

def init_q_mlp_params(key, input_size, num_actions, hidden_size):
    """Mimics nn.Linear default init (uniform +-1/sqrt(fan_in)).
    Weights stored transposed as (in, out); biases as (1, out). All f32."""
    d_in = input_size[0] * input_size[1]

    def linear(k, fan_in, fan_out):
        kw, kb = jax.random.split(k)
        bound = 1.0 / jnp.sqrt(float(fan_in))
        w = jax.random.uniform(kw, (fan_in, fan_out), jnp.float32, -bound, bound)
        b = jax.random.uniform(kb, (1, fan_out), jnp.float32, -bound, bound)
        return w, b

    k1, k2, k3 = jax.random.split(key, 3)
    w1, b1 = linear(k1, d_in, hidden_size)
    w2, b2 = linear(k2, hidden_size, hidden_size)
    w3, b3 = linear(k3, hidden_size, num_actions)
    return {"w1": w1, "b1": b1, "w2": w2, "b2": b2, "w3": w3, "b3": b3}


def prepare_q_mlp_params(params, input_size, num_actions, hidden_size,
                         compute_dtype=jnp.float32):
    """Zero-pad once to lane-aligned (128) shapes and pre-cast WEIGHTS to the
    compute dtype (bf16 recommended on v6e/v7x). Biases stay f32: they are tiny
    and are added to the f32 MXU accumulator, keeping elementwise math in f32."""
    d_in = input_size[0] * input_size[1]
    dp = max(_round_up(d_in, 128), 128)
    hp = max(_round_up(hidden_size, 128), 128)
    ap = max(_round_up(num_actions, 128), 128)

    def pad2(a, r, c, dtype):
        return jnp.pad(a, ((0, r - a.shape[0]), (0, c - a.shape[1]))).astype(dtype)

    return {
        "w1": pad2(params["w1"], dp, hp, compute_dtype),
        "b1": pad2(params["b1"], 1, hp, jnp.float32),
        "w2": pad2(params["w2"], hp, hp, compute_dtype),
        "b2": pad2(params["b2"], 1, hp, jnp.float32),
        "w3": pad2(params["w3"], hp, ap, compute_dtype),
        "b3": pad2(params["b3"], 1, ap, jnp.float32),
        "dims": (d_in, hidden_size, num_actions, dp, hp, ap),
    }


_SINGLE_BUFFER_OK = None  # cached capability of pipeline_mode=pl.Buffered(1)


def _resident_spec(shape, single_buffer):
    index_map = lambda i: (0,) * len(shape)
    if single_buffer:
        try:
            return pl.BlockSpec(shape, index_map, pipeline_mode=pl.Buffered(1))
        except Exception:
            pass
    return pl.BlockSpec(shape, index_map)


def q_mlp_forward(x, padded_params, *, batch_tile=None):
    """x: (B, S0, S1) float32 -> (B, num_actions) float32."""
    global _SINGLE_BUFFER_OK
    d_in, _, num_actions, dp, hp, ap = padded_params["dims"]

    b = x.shape[0]
    x2d = x.reshape(b, -1)  # x.view(x.shape[0], -1)
    assert x2d.shape[1] == d_in

    kind = _device_kind()
    num_cores = _num_tensorcores(kind)
    # v5e: smaller tiles (1 vst slot, spill-prone); v6e/v7x: 512 amortizes the
    # ~0.35us per-grid-step floor.
    tb_max = 256 if ("v5 lite" in kind or "v5e" in kind) else 512

    if batch_tile is not None:
        tb = _round_up(max(int(batch_tile), 8), 8)
        bp = _round_up(max(b, 8), 8)
        bp = _round_up(bp, tb)
    else:
        bp, tb = _pick_batch_tiling(b, tb_max, num_cores)

    xp = jnp.pad(x2d, ((0, bp - b), (0, dp - d_in)))

    w1, b1 = padded_params["w1"], padded_params["b1"]
    w2, b2 = padded_params["w2"], padded_params["b2"]
    w3, b3 = padded_params["w3"], padded_params["b3"]
    weights = (w1, b1, w2, b2, w3, b3)

    grid = (bp // tb,)
    x_bytes = jnp.dtype(x2d.dtype).itemsize

    # Advisory cost hint for XLA's scheduler.
    flops = 2 * bp * (dp * hp + hp * hp + hp * ap)
    bytes_accessed = (sum(_nbytes(a) for a in weights)
                      + bp * dp * x_bytes + bp * ap * x_bytes)
    cost = pl.CostEstimate(flops=flops, transcendentals=0,
                           bytes_accessed=bytes_accessed)

    def compiler_params(single_buffer):
        wbuf = 1 if single_buffer else 2
        vmem_needed = (wbuf * sum(_nbytes(a) for a in weights)            # resident params
                       + 2 * tb * dp * x_bytes + 2 * tb * ap * x_bytes    # x/out double buffers
                       + 4 * tb * (2 * hp + ap))                          # live activations / spill
        kwargs = dict(dimension_semantics=("parallel",))
        # Gate at the most conservative scoped default (16 MiB on v5e); cap with
        # headroom under physical VMEM (64 MiB per TC on v7x, 128 MiB on v5e/v6e).
        if vmem_needed > 16 * 1024 * 1024:
            phys = _vmem_physical_bytes()
            cap = max(phys - 12 * 1024 * 1024, phys * 3 // 4)
            kwargs["vmem_limit_bytes"] = int(min(vmem_needed * 3 // 2, cap))
        return pltpu.CompilerParams(**kwargs)

    # TODO(synk): for scaled hidden sizes whose resident weights exceed ~24 MiB on
    # v7x, stream K-tiles with an "arbitrary" grid axis + f32 VMEM accumulator
    # instead of keeping all weights resident.

    def call(single_buffer):
        in_specs = [pl.BlockSpec((tb, dp), lambda i: (i, 0))]
        in_specs += [_resident_spec(a.shape, single_buffer) for a in weights]
        return pl.pallas_call(
            _qmlp_kernel,
            out_shape=jax.ShapeDtypeStruct((bp, ap), x2d.dtype),
            grid=grid,
            in_specs=in_specs,
            out_specs=pl.BlockSpec((tb, ap), lambda i: (i, 0)),  # lane-dense store
            compiler_params=compiler_params(single_buffer),
            cost_estimate=cost,
        )(xp, *weights)

    if _SINGLE_BUFFER_OK is None:
        try:
            out = call(single_buffer=True)
            _SINGLE_BUFFER_OK = True
        except Exception:
            _SINGLE_BUFFER_OK = False
            out = call(single_buffer=False)
    else:
        out = call(single_buffer=_SINGLE_BUFFER_OK)

    # Strip batch + action padding.
    return out[:b, :num_actions]


# ------------------------------- test -------------------------------------- #

if __name__ == "__main__":
    key = jax.random.PRNGKey(0)
    kx, kp = jax.random.split(key)

    # Small, CartPole-like config: observation shaped (1, 4), 2 actions.
    batch = 2
    input_size = (1, 4)
    num_actions = 2
    hidden_size = 32

    x = jax.random.normal(kx, (batch, input_size[0], input_size[1]), jnp.float32)
    raw = init_q_mlp_params(kp, input_size, num_actions, hidden_size)

    HI = jax.lax.Precision.HIGHEST

    def torch_ref(xin):
        xf = xin.reshape(xin.shape[0], -1)
        h = jnp.maximum(jnp.dot(xf, raw["w1"], precision=HI) + raw["b1"], 0.0)
        h = jnp.maximum(jnp.dot(h, raw["w2"], precision=HI) + raw["b2"], 0.0)
        return jnp.maximum(jnp.dot(h, raw["w3"], precision=HI) + raw["b3"], 0.0)

    # Exact f32 path.
    params_f32 = prepare_q_mlp_params(raw, input_size, num_actions, hidden_size)
    out = q_mlp_forward(x, params_f32)
    jax.block_until_ready(out)
    assert out.shape == (batch, num_actions)
    assert jnp.allclose(out, torch_ref(x), atol=1e-5, rtol=1e-5)

    # Larger, non-tile-aligned batch -> multiple grid steps / low pad waste.
    big_b = 600
    xb = jax.random.normal(kx, (big_b, input_size[0], input_size[1]), jnp.float32)
    out_big = q_mlp_forward(xb, params_f32)
    jax.block_until_ready(out_big)
    assert out_big.shape == (big_b, num_actions)
    assert jnp.allclose(out_big, torch_ref(xb), atol=2e-5, rtol=2e-5)

    # bf16-weight MXU path (f32 accumulation) -> looser tolerance.
    params_bf16 = prepare_q_mlp_params(raw, input_size, num_actions, hidden_size,
                                       compute_dtype=jnp.bfloat16)
    out_bf16 = q_mlp_forward(x, params_bf16)
    jax.block_until_ready(out_bf16)
    assert out_bf16.shape == (batch, num_actions)
    assert jnp.allclose(out_bf16, torch_ref(x), atol=6e-2, rtol=6e-2)

    print("KERNEL_OK")
</pallas_src>

<mosaic_0001>
module attributes {stable_mosaic.version = 11 : i64} {
  func.func @_qmlp_kernel(%arg0: i32, %arg1: memref<8x128xf32, #tpu.memory_space<vmem>>, %arg2: memref<128x128xf32, #tpu.memory_space<vmem>>, %arg3: memref<1x128xf32, #tpu.memory_space<vmem>>, %arg4: memref<128x128xf32, #tpu.memory_space<vmem>>, %arg5: memref<1x128xf32, #tpu.memory_space<vmem>>, %arg6: memref<128x128xf32, #tpu.memory_space<vmem>>, %arg7: memref<1x128xf32, #tpu.memory_space<vmem>>, %arg8: memref<8x128xf32, #tpu.memory_space<vmem>>) attributes {dimension_semantics = [#tpu.dimension_semantics<parallel>], iteration_bounds = array<i64: 1>, scalar_prefetch = 0 : i64, scratch_operands = 0 : i64, tpu.core_type = #tpu.core_type<tc>, window_params = [{transform_indices = @transform_0, window_bounds = array<i64: 8, 128>}, {pipeline_mode = #tpu.pipeline_mode<synchronous>, transform_indices = @transform_1, window_bounds = array<i64: 128, 128>}, {pipeline_mode = #tpu.pipeline_mode<synchronous>, transform_indices = @transform_2, window_bounds = array<i64: 1, 128>}, {pipeline_mode = #tpu.pipeline_mode<synchronous>, transform_indices = @transform_3, window_bounds = array<i64: 128, 128>}, {pipeline_mode = #tpu.pipeline_mode<synchronous>, transform_indices = @transform_4, window_bounds = array<i64: 1, 128>}, {pipeline_mode = #tpu.pipeline_mode<synchronous>, transform_indices = @transform_5, window_bounds = array<i64: 128, 128>}, {pipeline_mode = #tpu.pipeline_mode<synchronous>, transform_indices = @transform_6, window_bounds = array<i64: 1, 128>}, {transform_indices = @transform_7, window_bounds = array<i64: 8, 128>}]} {
    %c0 = arith.constant 0 : index
    %c0_0 = arith.constant 0 : index
    %0 = vector.load %arg1[%c0, %c0_0] : memref<8x128xf32, #tpu.memory_space<vmem>>, vector<8x128xf32>
    %c0_1 = arith.constant 0 : index
    %c0_2 = arith.constant 0 : index
    %1 = vector.load %arg2[%c0_1, %c0_2] : memref<128x128xf32, #tpu.memory_space<vmem>>, vector<128x128xf32>
    %cst = arith.constant dense<0.000000e+00> : vector<8x128xf32>
    %2 = tpu.matmul %0, %1, %cst {dimension_numbers = #tpu.dot_dimension_numbers<[1], [0], [0], [1], [0, 0, 1, 1], [], []>} : vector<8x128xf32>, vector<128x128xf32>, vector<8x128xf32> -> vector<8x128xf32>
    %c0_3 = arith.constant 0 : index
    %c0_4 = arith.constant 0 : index
    %3 = vector.load %arg3[%c0_3, %c0_4] : memref<1x128xf32, #tpu.memory_space<vmem>>, vector<1x128xf32>
    %4 = vector.broadcast %3 : vector<1x128xf32> to vector<8x128xf32>
    %5 = arith.addf %2, %4 : vector<8x128xf32>
    %cst_5 = arith.constant 0.000000e+00 : f32
    %6 = vector.broadcast %cst_5 : f32 to vector<8x128xf32>
    %7 = arith.maximumf %5, %6 : vector<8x128xf32>
    %c0_6 = arith.constant 0 : index
    %c0_7 = arith.constant 0 : index
    %8 = vector.load %arg4[%c0_6, %c0_7] : memref<128x128xf32, #tpu.memory_space<vmem>>, vector<128x128xf32>
    %cst_8 = arith.constant dense<0.000000e+00> : vector<8x128xf32>
    %9 = tpu.matmul %7, %8, %cst_8 {dimension_numbers = #tpu.dot_dimension_numbers<[1], [0], [0], [1], [0, 0, 1, 1], [], []>} : vector<8x128xf32>, vector<128x128xf32>, vector<8x128xf32> -> vector<8x128xf32>
    %c0_9 = arith.constant 0 : index
    %c0_10 = arith.constant 0 : index
    %10 = vector.load %arg5[%c0_9, %c0_10] : memref<1x128xf32, #tpu.memory_space<vmem>>, vector<1x128xf32>
    %11 = vector.broadcast %10 : vector<1x128xf32> to vector<8x128xf32>
    %12 = arith.addf %9, %11 : vector<8x128xf32>
    %cst_11 = arith.constant 0.000000e+00 : f32
    %13 = vector.broadcast %cst_11 : f32 to vector<8x128xf32>
    %14 = arith.maximumf %12, %13 : vector<8x128xf32>
    %c0_12 = arith.constant 0 : index
    %c0_13 = arith.constant 0 : index
    %15 = vector.load %arg6[%c0_12, %c0_13] : memref<128x128xf32, #tpu.memory_space<vmem>>, vector<128x128xf32>
    %cst_14 = arith.constant dense<0.000000e+00> : vector<8x128xf32>
    %16 = tpu.matmul %14, %15, %cst_14 {dimension_numbers = #tpu.dot_dimension_numbers<[1], [0], [0], [1], [0, 0, 1, 1], [], []>} : vector<8x128xf32>, vector<128x128xf32>, vector<8x128xf32> -> vector<8x128xf32>
    %c0_15 = arith.constant 0 : index
    %c0_16 = arith.constant 0 : index
    %17 = vector.load %arg7[%c0_15, %c0_16] : memref<1x128xf32, #tpu.memory_space<vmem>>, vector<1x128xf32>
    %18 = vector.broadcast %17 : vector<1x128xf32> to vector<8x128xf32>
    %19 = arith.addf %16, %18 : vector<8x128xf32>
    %cst_17 = arith.constant 0.000000e+00 : f32
    %20 = vector.broadcast %cst_17 : f32 to vector<8x128xf32>
    %21 = arith.maximumf %19, %20 : vector<8x128xf32>
    %c0_18 = arith.constant 0 : index
    %c0_19 = arith.constant 0 : index
    %22 = vector.load %arg8[%c0_18, %c0_19] : memref<8x128xf32, #tpu.memory_space<vmem>>, vector<8x128xf32>
    tpu.vector_store %arg8[%c0_18, %c0_19], %21 {strides = array<i32>} : memref<8x128xf32, #tpu.memory_space<vmem>>, vector<8x128xf32>,
    return
  }
  func.func @transform_0(%arg0: i32) -> (i32, i32) {
    %c0_i32 = arith.constant 0 : i32
    %c0_i32_0 = arith.constant 0 : i32
    return %arg0, %c0_i32 : i32, i32
  }
  func.func @transform_1(%arg0: i32) -> (i32, i32) {
    %c0_i32 = arith.constant 0 : i32
    %c0_i32_0 = arith.constant 0 : i32
    %c0_i32_1 = arith.constant 0 : i32
    return %c0_i32, %c0_i32_0 : i32, i32
  }
  func.func @transform_2(%arg0: i32) -> (i32, i32) {
    %c0_i32 = arith.constant 0 : i32
    %c0_i32_0 = arith.constant 0 : i32
    %c0_i32_1 = arith.constant 0 : i32
    return %c0_i32, %c0_i32_0 : i32, i32
  }
  func.func @transform_3(%arg0: i32) -> (i32, i32) {
    %c0_i32 = arith.constant 0 : i32
    %c0_i32_0 = arith.constant 0 : i32
    %c0_i32_1 = arith.constant 0 : i32
    return %c0_i32, %c0_i32_0 : i32, i32
  }
  func.func @transform_4(%arg0: i32) -> (i32, i32) {
    %c0_i32 = arith.constant 0 : i32
    %c0_i32_0 = arith.constant 0 : i32
    %c0_i32_1 = arith.constant 0 : i32
    return %c0_i32, %c0_i32_0 : i32, i32
  }
  func.func @transform_5(%arg0: i32) -> (i32, i32) {
    %c0_i32 = arith.constant 0 : i32
    %c0_i32_0 = arith.constant 0 : i32
    %c0_i32_1 = arith.constant 0 : i32
    return %c0_i32, %c0_i32_0 : i32, i32
  }
  func.func @transform_6(%arg0: i32) -> (i32, i32) {
    %c0_i32 = arith.constant 0 : i32
    %c0_i32_0 = arith.constant 0 : i32
    %c0_i32_1 = arith.constant 0 : i32
    return %c0_i32, %c0_i32_0 : i32, i32
  }
  func.func @transform_7(%arg0: i32) -> (i32, i32) {
    %c0_i32 = arith.constant 0 : i32
    %c0_i32_0 = arith.constant 0 : i32
    return %arg0, %c0_i32 : i32, i32
  }
}

module attributes {stable_mosaic.version = 11 : i64} {
  func.func @_qmlp_kernel(%arg0: i32, %arg1: memref<8x128xf32, #tpu.memory_space<vmem>>, %arg2: memref<128x128xf32, #tpu.memory_space<vmem>>, %arg3: memref<1x128xf32, #tpu.memory_space<vmem>>, %arg4: memref<128x128xf32, #tpu.memory_space<vmem>>, %arg5: memref<1x128xf32, #tpu.memory_space<vmem>>, %arg6: memref<128x128xf32, #tpu.memory_space<vmem>>, %arg7: memref<1x128xf32, #tpu.memory_space<vmem>>, %arg8: memref<8x128xf32, #tpu.memory_space<vmem>>) attributes {dimension_semantics = [#tpu.dimension_semantics<parallel>], iteration_bounds = array<i64: 1>, scalar_prefetch = 0 : i64, scratch_operands = 0 : i64, tpu.core_type = #tpu.core_type<tc>, window_params = [{transform_indices = @transform_0, window_bounds = array<i64: 8, 128>}, {pipeline_mode = #tpu.pipeline_mode<synchronous>, transform_indices = @transform_1, window_bounds = array<i64: 128, 128>}, {pipeline_mode = #tpu.pipeline_mode<synchronous>, transform_indices = @transform_2, window_bounds = array<i64: 1, 128>}, {pipeline_mode = #tpu.pipeline_mode<synchronous>, transform_indices = @transform_3, window_bounds = array<i64: 128, 128>}, {pipeline_mode = #tpu.pipeline_mode<synchronous>, transform_indices = @transform_4, window_bounds = array<i64: 1, 128>}, {pipeline_mode = #tpu.pipeline_mode<synchronous>, transform_indices = @transform_5, window_bounds = array<i64: 128, 128>}, {pipeline_mode = #tpu.pipeline_mode<synchronous>, transform_indices = @transform_6, window_bounds = array<i64: 1, 128>}, {transform_indices = @transform_7, window_bounds = array<i64: 8, 128>}]} {
    %c0 = arith.constant 0 : index
    %c0_0 = arith.constant 0 : index
    %0 = vector.load %arg1[%c0, %c0_0] : memref<8x128xf32, #tpu.memory_space<vmem>>, vector<8x128xf32>
    %c0_1 = arith.constant 0 : index
    %c0_2 = arith.constant 0 : index
    %1 = vector.load %arg2[%c0_1, %c0_2] : memref<128x128xf32, #tpu.memory_space<vmem>>, vector<128x128xf32>
    %cst = arith.constant dense<0.000000e+00> : vector<8x128xf32>
    %2 = tpu.matmul %0, %1, %cst {dimension_numbers = #tpu.dot_dimension_numbers<[1], [0], [0], [1], [0, 0, 1, 1], [], []>} : vector<8x128xf32>, vector<128x128xf32>, vector<8x128xf32> -> vector<8x128xf32>
    %c0_3 = arith.constant 0 : index
    %c0_4 = arith.constant 0 : index
    %3 = vector.load %arg3[%c0_3, %c0_4] : memref<1x128xf32, #tpu.memory_space<vmem>>, vector<1x128xf32>
    %4 = vector.broadcast %3 : vector<1x128xf32> to vector<8x128xf32>
    %5 = arith.addf %2, %4 : vector<8x128xf32>
    %cst_5 = arith.constant 0.000000e+00 : f32
    %6 = vector.broadcast %cst_5 : f32 to vector<8x128xf32>
    %7 = arith.maximumf %5, %6 : vector<8x128xf32>
    %c0_6 = arith.constant 0 : index
    %c0_7 = arith.constant 0 : index
    %8 = vector.load %arg4[%c0_6, %c0_7] : memref<128x128xf32, #tpu.memory_space<vmem>>, vector<128x128xf32>
    %cst_8 = arith.constant dense<0.000000e+00> : vector<8x128xf32>
    %9 = tpu.matmul %7, %8, %cst_8 {dimension_numbers = #tpu.dot_dimension_numbers<[1], [0], [0], [1], [0, 0, 1, 1], [], []>} : vector<8x128xf32>, vector<128x128xf32>, vector<8x128xf32> -> vector<8x128xf32>
    %c0_9 = arith.constant 0 : index
    %c0_10 = arith.constant 0 : index
    %10 = vector.load %arg5[%c0_9, %c0_10] : memref<1x128xf32, #tpu.memory_space<vmem>>, vector<1x128xf32>
    %11 = vector.broadcast %10 : vector<1x128xf32> to vector<8x128xf32>
    %12 = arith.addf %9, %11 : vector<8x128xf32>
    %cst_11 = arith.constant 0.000000e+00 : f32
    %13 = vector.broadcast %cst_11 : f32 to vector<8x128xf32>
    %14 = arith.maximumf %12, %13 : vector<8x128xf32>
    %c0_12 = arith.constant 0 : index
    %c0_13 = arith.constant 0 : index
    %15 = vector.load %arg6[%c0_12, %c0_13] : memref<128x128xf32, #tpu.memory_space<vmem>>, vector<128x128xf32>
    %cst_14 = arith.constant dense<0.000000e+00> : vector<8x128xf32>
    %16 = tpu.matmul %14, %15, %cst_14 {dimension_numbers = #tpu.dot_dimension_numbers<[1], [0], [0], [1], [0, 0, 1, 1], [], []>} : vector<8x128xf32>, vector<128x128xf32>, vector<8x128xf32> -> vector<8x128xf32>
    %c0_15 = arith.constant 0 : index
    %c0_16 = arith.constant 0 : index
    %17 = vector.load %arg7[%c0_15, %c0_16] : memref<1x128xf32, #tpu.memory_space<vmem>>, vector<1x128xf32>
    %18 = vector.broadcast %17 : vector<1x128xf32> to vector<8x128xf32>
    %19 = arith.addf %16, %18 : vector<8x128xf32>
    %cst_17 = arith.constant 0.000000e+00 : f32
    %20 = vector.broadcast %cst_17 : f32 to vector<8x128xf32>
    %21 = arith.maximumf %19, %20 : vector<8x128xf32>
    %c0_18 = arith.constant 0 : index
    %c0_19 = arith.constant 0 : index
    %22 = vector.load %arg8[%c0_18, %c0_19] : memref<8x128xf32, #tpu.memory_space<vmem>>, vector<8x128xf32>
    tpu.vector_store %arg8[%c0_18, %c0_19], %21 {strides = array<i32>} : memref<8x128xf32, #tpu.memory_space<vmem>>, vector<8x128xf32>,
    return
  }
  func.func @transform_0(%arg0: i32) -> (i32, i32) {
    %c0_i32 = arith.constant 0 : i32
    %c0_i32_0 = arith.constant 0 : i32
    return %arg0, %c0_i32 : i32, i32
  }
  func.func @transform_1(%arg0: i32) -> (i32, i32) {
    %c0_i32 = arith.constant 0 : i32
    %c0_i32_0 = arith.constant 0 : i32
    %c0_i32_1 = arith.constant 0 : i32
    return %c0_i32, %c0_i32_0 : i32, i32
  }
  func.func @transform_2(%arg0: i32) -> (i32, i32) {
    %c0_i32 = arith.constant 0 : i32
    %c0_i32_0 = arith.constant 0 : i32
    %c0_i32_1 = arith.constant 0 : i32
    return %c0_i32, %c0_i32_0 : i32, i32
  }
  func.func @transform_3(%arg0: i32) -> (i32, i32) {
    %c0_i32 = arith.constant 0 : i32
    %c0_i32_0 = arith.constant 0 : i32
    %c0_i32_1 = arith.constant 0 : i32
    return %c0_i32, %c0_i32_0 : i32, i32
  }
  func.func @transform_4(%arg0: i32) -> (i32, i32) {
    %c0_i32 = arith.constant 0 : i32
    %c0_i32_0 = arith.constant 0 : i32
    %c0_i32_1 = arith.constant 0 : i32
    return %c0_i32, %c0_i32_0 : i32, i32
  }
  func.func @transform_5(%arg0: i32) -> (i32, i32) {
    %c0_i32 = arith.constant 0 : i32
    %c0_i32_0 = arith.constant 0 : i32
    %c0_i32_1 = arith.constant 0 : i32
    return %c0_i32, %c0_i32_0 : i32, i32
  }
  func.func @transform_6(%arg0: i32) -> (i32, i32) {
    %c0_i32 = arith.constant 0 : i32
    %c0_i32_0 = arith.constant 0 : i32
    %c0_i32_1 = arith.constant 0 : i32
    return %c0_i32, %c0_i32_0 : i32, i32
  }
  func.func @transform_7(%arg0: i32) -> (i32, i32) {
    %c0_i32 = arith.constant 0 : i32
    %c0_i32_0 = arith.constant 0 : i32
    return %arg0, %c0_i32 : i32, i32
  }
}

</mosaic_0001>

<bundles_post_ra>
// kernel: tpu_custom_call.1
= control target key start
LH: loop header
LB: loop body
LE: loop exit
PB: predicated region body
PF: predicated region fallthrough
CT: control target
= control target key end

     0   :  { %12 = vsyncpa [#allocation3], 0  ;;  %s441_s0 = inlined_call_operand.hbm [shape: f32[8,128], index: 0, kind: input, shape index: {}]   ;;  %s442_s1 = inlined_call_operand.hbm [shape: f32[128,128], index: 1, kind: input, shape index: {}]   ;;  %s443_s2 = inlined_call_operand.vmem [shape: f32[1,128], index: 2, kind: input, shape index: {}]   ;;  %s444_s3 = inlined_call_operand.hbm [shape: f32[128,128], index: 3, kind: input, shape index: {}]   ;;  %s445_s4 = inlined_call_operand.vmem [shape: f32[1,128], index: 4, kind: input, shape index: {}]   ;;  %s446_s5 = inlined_call_operand.hbm [shape: f32[128,128], index: 5, kind: input, shape index: {}]   ;;  %s447_s6 = inlined_call_operand.vmem [shape: f32[1,128], index: 6, kind: input, shape index: {}]   ;;  %s448_s7 = inlined_call_operand.hbm [shape: f32[8,128], index: 7, kind: output, shape index: {}]  }
   0x1   :  { %13 = vsyncpa [#allocation6], 0 }
   0x2   :  { %14 = vsyncpa [#allocation9], 0  ;;  %s31_s26 = sshll.u32 %s442_s1, 4  ;;  %s32_s26 = int_to_ptr.hbm [resolvable:$true] %s31_s26 }
   0x3   :  { %15 = vsyncpa [#allocation4], 0  ;;  %s370_s27 = smov [#allocation5]   ;;  %s21_s8 = sshll.u32 %s441_s0, 4  ;;  %s22_s8 = int_to_ptr.hbm [resolvable:$true] %s21_s8 }
   0x4   :  { %s33_s28 = sshll.u32 %s370_s27, 4  ;;  %s371_s9 = smov 128   ;;  %s34_s28 = int_to_ptr.vmem [resolvable:$true] %s33_s28 }
   0x5   :  { %s372_s10 = smov 8   ;;  %s373_s11 = smov [#allocation2]  }
   0x6   :  { %39 = dma.hbm_to_vmem [thread:$0]  %s32_s26, 2048, %s34_s28, [#allocation6], %s371_s9, %s371_s9, %s372_s10  }
   0x7   :  { %s23_s12 = sshll.u32 %s373_s11, 4  ;;  %s46_s15 = sshll.u32 %s444_s3, 4  ;;  %s24_s12 = int_to_ptr.vmem [resolvable:$true] %s23_s12  ;;  %s47_s15 = int_to_ptr.hbm [resolvable:$true] %s46_s15 }
   0x8   :  { %26 = dma.hbm_to_vmem [thread:$0]  %s22_s8, 128, %s24_s12, [#allocation3]  }
   0x9   :  { %s61_s17 = sshll.u32 %s446_s5, 4  ;;  %s374_s18 = smov [#allocation7]   ;;  %s62_s17 = int_to_ptr.hbm [resolvable:$true] %s61_s17 }
   0xa   :  { %s48_s19 = sshll.u32 %s374_s18, 4  ;;  %s375_s0 = smov [#allocation8]   ;;  %s49_s19 = int_to_ptr.vmem [resolvable:$true] %s48_s19 }
   0xb   :  { %54 = dma.hbm_to_vmem [thread:$0]  %s47_s15, 2048, %s49_s19, [#allocation6], %s371_s9, %s371_s9, %s372_s10  }
   0xc   :  { %s63_s20 = sshll.u32 %s375_s0, 4  ;;  %s64_s20 = int_to_ptr.vmem [resolvable:$true] %s63_s20 }
   0xd   :  { %69 = dma.hbm_to_vmem [thread:$0]  %s62_s17, 2048, %s64_s20, [#allocation9], %s371_s9, %s371_s9, %s372_s10  }
   0xe   :  { %362 = dma.done.wait [#allocation3], 128  }
   0xf   :  { %363 = vsyncadd [#allocation3], 4294967168 }
  0x10   :  { %364 = dma.done.wait [#allocation6], 4096  }
  0x11   :  { %365 = vsyncadd [#allocation6], 4294963200 }
  0x12   :  { %366 = dma.done.wait [#allocation9], 2048  }
  0x13   :  { %367 = vsyncadd [#allocation9], 4294965248  ;;  %v104_v0 = vld [vmem:[#allocation5 + $0x78] sm:$0xff]  ;;  %v103_v1 = vld [vmem:[#allocation5 + $0x70] sm:$0xff]  ;;  %s376_s24 = smov [#allocation10]   ;;  %s220_s28 = sshll.u32 %s448_s7, 4  ;;  %s221_s28 = int_to_ptr.hbm [resolvable:$true] %s220_s28 }
  0x14   :  { %109 = vmatpush.msra.mxu0 %v104_v0  ;;  %v102_v2 = vld [vmem:[#allocation5 + $0x68] sm:$0xff]  ;;  %v101_v3 = vld [vmem:[#allocation5 + $0x60] sm:$0xff]  ;;  %v145_v4 = vld [vmem:[#allocation7 + $0x78] sm:$0xff]  ;;  %s218_s25 = sshll.u32 %s376_s24, 4  ;;  %s219_s25 = int_to_ptr.vmem [resolvable:$true] %s218_s25 }
  0x15   :  { %v100_v5 = vld [vmem:[#allocation5 + $0x58] sm:$0xff]  ;;  %150 = vmatpush.msra.mxu1 %v145_v4  ;;  %v144_v6 = vld [vmem:[#allocation7 + $0x70] sm:$0xff]  ;;  %v143_v7 = vld [vmem:[#allocation7 + $0x68] sm:$0xff] }
  0x16   :  { %110 = vmatpush.msra.mxu0 %v103_v1  ;;  %v99_v8 = vld [vmem:[#allocation5 + $0x50] sm:$0xff]  ;;  %v142_v9 = vld [vmem:[#allocation7 + $0x60] sm:$0xff]  ;;  %v98_v10 = vld [vmem:[#allocation5 + $0x48] sm:$0xff] }
  0x17   :  { %151 = vmatpush.msra.mxu1 %v144_v6  ;;  %v141_v11 = vld [vmem:[#allocation7 + $0x58] sm:$0xff]  ;;  %v97_v12 = vld [vmem:[#allocation5 + $0x40] sm:$0xff]  ;;  %v140_v13 = vld [vmem:[#allocation7 + $0x50] sm:$0xff] }
  0x18   :  { %111 = vmatpush.msra.mxu0 %v102_v2  ;;  %v96_v14 = vld [vmem:[#allocation5 + $0x38] sm:$0xff]  ;;  %v139_v15 = vld [vmem:[#allocation7 + $0x48] sm:$0xff]  ;;  %v95_v16 = vld [vmem:[#allocation5 + $0x30] sm:$0xff] }
  0x19   :  { %152 = vmatpush.msra.mxu1 %v143_v7  ;;  %v138_v17 = vld [vmem:[#allocation7 + $0x40] sm:$0xff]  ;;  %v94_v18 = vld [vmem:[#allocation5 + $0x28] sm:$0xff]  ;;  %v137_v19 = vld [vmem:[#allocation7 + $0x38] sm:$0xff] }
  0x1a   :  { %112 = vmatpush.msra.mxu0 %v101_v3  ;;  %v93_v20 = vld [vmem:[#allocation5 + $0x20] sm:$0xff]  ;;  %v136_v21 = vld [vmem:[#allocation7 + $0x30] sm:$0xff]  ;;  %v92_v22 = vld [vmem:[#allocation5 + $0x18] sm:$0xff] }
  0x1b   :  { %153 = vmatpush.msra.mxu1 %v142_v9  ;;  %v135_v23 = vld [vmem:[#allocation7 + $0x28] sm:$0xff]  ;;  %v91_v24 = vld [vmem:[#allocation5 + $0x10] sm:$0xff]  ;;  %v134_v25 = vld [vmem:[#allocation7 + $0x20] sm:$0xff] }
  0x1c   :  { %113 = vmatpush.msra.mxu0 %v100_v5  ;;  %v90_v26 = vld [vmem:[#allocation5 + $0x8] sm:$0xff]  ;;  %v133_v27 = vld [vmem:[#allocation7 + $0x18] sm:$0xff]  ;;  %v89_v28 = vld [vmem:[#allocation5] sm:$0xff] }
  0x1d   :  { %154 = vmatpush.msra.mxu1 %v141_v11  ;;  %v88_v29 = vld [vmem:[#allocation2] sm:$0xff]  ;;  %v132_v30 = vld [vmem:[#allocation7 + $0x10] sm:$0xff]  ;;  %v131_v31 = vld [vmem:[#allocation7 + $0x8] sm:$0xff] }
  0x1e   :  { %114 = vmatpush.msra.mxu0 %v99_v8  ;;  %v130_v32 = vld [vmem:[#allocation7] sm:$0xff]  ;;  %v186_v33 = vld [vmem:[#allocation8 + $0x78] sm:$0xff]  ;;  %v185_v34 = vld [vmem:[#allocation8 + $0x70] sm:$0xff] }
  0x1f   :  { %155 = vmatpush.msra.mxu1 %v140_v13  ;;  %191 = vmatpush.msra.mxu2 %v186_v33  ;;  %v184_v35 = vld [vmem:[#allocation8 + $0x68] sm:$0xff]  ;;  %v183_v36 = vld [vmem:[#allocation8 + $0x60] sm:$0xff]  ;;  %v182_v37 = vld [vmem:[#allocation8 + $0x58] sm:$0xff] }
  0x20   :  { %115 = vmatpush.msra.mxu0 %v98_v10  ;;  %v181_v38 = vld [vmem:[#allocation8 + $0x50] sm:$0xff]  ;;  %v180_v39 = vld [vmem:[#allocation8 + $0x48] sm:$0xff]  ;;  %v179_v40 = vld [vmem:[#allocation8 + $0x40] sm:$0xff] }
  0x21   :  { %156 = vmatpush.msra.mxu1 %v139_v15  ;;  %192 = vmatpush.msra.mxu2 %v185_v34  ;;  %v178_v41 = vld [vmem:[#allocation8 + $0x38] sm:$0xff]  ;;  %v177_v42 = vld [vmem:[#allocation8 + $0x30] sm:$0xff]  ;;  %v176_v43 = vld [vmem:[#allocation8 + $0x28] sm:$0xff] }
  0x22   :  { %116 = vmatpush.msra.mxu0 %v97_v12  ;;  %v175_v44 = vld [vmem:[#allocation8 + $0x20] sm:$0xff]  ;;  %v174_v45 = vld [vmem:[#allocation8 + $0x18] sm:$0xff]  ;;  %v173_v50 = vld [vmem:[#allocation8 + $0x10] sm:$0xff] }
  0x23   :  { %157 = vmatpush.msra.mxu1 %v138_v17  ;;  %193 = vmatpush.msra.mxu2 %v184_v35  ;;  %v239_v46 = vld [vmem:[%s443_s2] ss:$0 sm:$0xff]  ;;  %v172_v51 = vld [vmem:[#allocation8 + $0x8] sm:$0xff]  ;;  %v171_v52 = vld [vmem:[#allocation8] sm:$0xff] }
  0x24   :  { %117 = vmatpush.msra.mxu0 %v96_v14  ;;  %v240_v53 = vld [vmem:[%s445_s4] ss:$0 sm:$0xff] }
  0x25   :  { %158 = vmatpush.msra.mxu1 %v137_v19  ;;  %194 = vmatpush.msra.mxu2 %v183_v36  ;;  %v241_v57 = vld [vmem:[%s447_s6] ss:$0 sm:$0xff] }
  0x26   :  { %118 = vmatpush.msra.mxu0 %v95_v16 }
  0x27   :  { %159 = vmatpush.msra.mxu1 %v136_v21  ;;  %195 = vmatpush.msra.mxu2 %v182_v37 }
  0x28   :  { %119 = vmatpush.msra.mxu0 %v94_v18 }
  0x29   :  { %160 = vmatpush.msra.mxu1 %v135_v23  ;;  %196 = vmatpush.msra.mxu2 %v181_v38 }
  0x2a   :  { %120 = vmatpush.msra.mxu0 %v93_v20 }
  0x2b   :  { %161 = vmatpush.msra.mxu1 %v134_v25  ;;  %197 = vmatpush.msra.mxu2 %v180_v39 }
  0x2c   :  { %121 = vmatpush.msra.mxu0 %v92_v22 }
  0x2d   :  { %162 = vmatpush.msra.mxu1 %v133_v27  ;;  %198 = vmatpush.msra.mxu2 %v179_v40 }
  0x2e   :  { %122 = vmatpush.msra.mxu0 %v91_v24 }
  0x2f   :  { %163 = vmatpush.msra.mxu1 %v132_v30  ;;  %199 = vmatpush.msra.mxu2 %v178_v41 }
  0x30   :  { %123 = vmatpush.msra.mxu0 %v90_v26 }
  0x31   :  { %164 = vmatpush.msra.mxu1 %v131_v31  ;;  %200 = vmatpush.msra.mxu2 %v177_v42 }
  0x32   :  { %124 = vmatpush.msra.mxu0 %v89_v28 }
  0x33   :  { %125 = vmatmul.f32.vlgmr.msra.gmra.mxu0 %v88_v29  ;;  %165 = vmatpush.msra.mxu1 %v130_v32 }
  0x34   :  { %201 = vmatpush.msra.mxu2 %v176_v43 }
  0x36   :  { %202 = vmatpush.msra.mxu2 %v175_v44 }
  0x38   :  { %203 = vmatpush.msra.mxu2 %v174_v45 }
  0x3a   :  { %204 = vmatpush.msra.mxu2 %v173_v50 }
  0x3c   :  { %205 = vmatpush.msra.mxu2 %v172_v51 }
  0x3e   :  { %206 = vmatpush.msra.mxu2 %v171_v52 }
  0xb0   :  { %v126_v47 = vpop.f32.mrf.mxu0 }
  0xb1   :  { %v127_v48 = vadd.f32 %v239_v46, %v126_v47 }
  0xb3   :  { %v129_v49 = vmax.f32 %v127_v48, 0.0 }
  0xb5   :  { %166 = vmatmul.f32.vlgmr.msra.gmra.mxu1 %v129_v49 }
 0x132   :  { %v167_v54 = vpop.f32.mrf.mxu1 }
 0x133   :  { %v168_v55 = vadd.f32 %v240_v53, %v167_v54 }
 0x135   :  { %v170_v56 = vmax.f32 %v168_v55, 0.0 }
 0x137   :  { %207 = vmatmul.f32.vlgmr.msra.gmra.mxu2 %v170_v56 }
 0x1ba   :  { %v208_v58 = vpop.f32.mrf.mxu2 }
 0x1bb   :  { %v209_v59 = vadd.f32 %v241_v57, %v208_v58 }
 0x1bd   :  { %v211_v60 = vmax.f32 %v209_v59, 0.0 }
 0x1bf   :  { %212 = vst [vmem:[#allocation10] sm:$0xff] %v211_v60 }
 0x1c0   :  { %223 = dma.vmem_to_hbm [thread:$0]  %s219_s25, 128, %s221_s28, [#allocation4]  }
 0x1c1   :  { %368 = dma.done.wait [#allocation4], 128  }
 0x1c2   :  { %369 = vsyncadd [#allocation4], 4294967168 }
 0x1c3   :  { %228 = vsyncpa [#allocation3], 1 }
 0x1c4   :  { %229 = vsyncpa [#allocation6], 1 }
 0x1c5   :  { %230 = vsyncpa [#allocation9], 1 }
 0x1c6   :  { %231 = vsyncpa [#allocation4], 1 }

// kernel: tpu_custom_call.1
= control target key start
LH: loop header
LB: loop body
LE: loop exit
PB: predicated region body
PF: predicated region fallthrough
CT: control target
= control target key end

     0   :  { %12 = vsyncpa [#allocation3], 0  ;;  %s441_s0 = inlined_call_operand.hbm [shape: f32[8,128], index: 0, kind: input, shape index: {}]   ;;  %s442_s1 = inlined_call_operand.hbm [shape: f32[128,128], index: 1, kind: input, shape index: {}]   ;;  %s443_s2 = inlined_call_operand.vmem [shape: f32[1,128], index: 2, kind: input, shape index: {}]   ;;  %s444_s3 = inlined_call_operand.hbm [shape: f32[128,128], index: 3, kind: input, shape index: {}]   ;;  %s445_s4 = inlined_call_operand.vmem [shape: f32[1,128], index: 4, kind: input, shape index: {}]   ;;  %s446_s5 = inlined_call_operand.hbm [shape: f32[128,128], index: 5, kind: input, shape index: {}]   ;;  %s447_s6 = inlined_call_operand.vmem [shape: f32[1,128], index: 6, kind: input, shape index: {}]   ;;  %s448_s7 = inlined_call_operand.hbm [shape: f32[8,128], index: 7, kind: output, shape index: {}]  }
   0x1   :  { %13 = vsyncpa [#allocation6], 0 }
   0x2   :  { %14 = vsyncpa [#allocation9], 0  ;;  %s31_s26 = sshll.u32 %s442_s1, 4  ;;  %s32_s26 = int_to_ptr.hbm [resolvable:$true] %s31_s26 }
   0x3   :  { %15 = vsyncpa [#allocation4], 0  ;;  %s370_s27 = smov [#allocation5]   ;;  %s21_s8 = sshll.u32 %s441_s0, 4  ;;  %s22_s8 = int_to_ptr.hbm [resolvable:$true] %s21_s8 }
   0x4   :  { %s33_s28 = sshll.u32 %s370_s27, 4  ;;  %s371_s9 = smov 128   ;;  %s34_s28 = int_to_ptr.vmem [resolvable:$true] %s33_s28 }
   0x5   :  { %s372_s10 = smov 8   ;;  %s373_s11 = smov [#allocation2]  }
   0x6   :  { %39 = dma.hbm_to_vmem [thread:$0]  %s32_s26, 2048, %s34_s28, [#allocation6], %s371_s9, %s371_s9, %s372_s10  }
   0x7   :  { %s23_s12 = sshll.u32 %s373_s11, 4  ;;  %s46_s15 = sshll.u32 %s444_s3, 4  ;;  %s24_s12 = int_to_ptr.vmem [resolvable:$true] %s23_s12  ;;  %s47_s15 = int_to_ptr.hbm [resolvable:$true] %s46_s15 }
   0x8   :  { %26 = dma.hbm_to_vmem [thread:$0]  %s22_s8, 128, %s24_s12, [#allocation3]  }
   0x9   :  { %s61_s17 = sshll.u32 %s446_s5, 4  ;;  %s374_s18 = smov [#allocation7]   ;;  %s62_s17 = int_to_ptr.hbm [resolvable:$true] %s61_s17 }
   0xa   :  { %s48_s19 = sshll.u32 %s374_s18, 4  ;;  %s375_s0 = smov [#allocation8]   ;;  %s49_s19 = int_to_ptr.vmem [resolvable:$true] %s48_s19 }
   0xb   :  { %54 = dma.hbm_to_vmem [thread:$0]  %s47_s15, 2048, %s49_s19, [#allocation6], %s371_s9, %s371_s9, %s372_s10  }
   0xc   :  { %s63_s20 = sshll.u32 %s375_s0, 4  ;;  %s64_s20 = int_to_ptr.vmem [resolvable:$true] %s63_s20 }
   0xd   :  { %69 = dma.hbm_to_vmem [thread:$0]  %s62_s17, 2048, %s64_s20, [#allocation9], %s371_s9, %s371_s9, %s372_s10  }
   0xe   :  { %362 = dma.done.wait [#allocation3], 128  }
   0xf   :  { %363 = vsyncadd [#allocation3], 4294967168 }
  0x10   :  { %364 = dma.done.wait [#allocation6], 4096  }
  0x11   :  { %365 = vsyncadd [#allocation6], 4294963200 }
  0x12   :  { %366 = dma.done.wait [#allocation9], 2048  }
  0x13   :  { %367 = vsyncadd [#allocation9], 4294965248  ;;  %v104_v0 = vld [vmem:[#allocation5 + $0x78] sm:$0xff]  ;;  %v103_v1 = vld [vmem:[#allocation5 + $0x70] sm:$0xff]  ;;  %s376_s24 = smov [#allocation10]   ;;  %s220_s28 = sshll.u32 %s448_s7, 4  ;;  %s221_s28 = int_to_ptr.hbm [resolvable:$true] %s220_s28 }
  0x14   :  { %109 = vmatpush.msra.mxu0 %v104_v0  ;;  %v102_v2 = vld [vmem:[#allocation5 + $0x68] sm:$0xff]  ;;  %v101_v3 = vld [vmem:[#allocation5 + $0x60] sm:$0xff]  ;;  %v145_v4 = vld [vmem:[#allocation7 + $0x78] sm:$0xff]  ;;  %s218_s25 = sshll.u32 %s376_s24, 4  ;;  %s219_s25 = int_to_ptr.vmem [resolvable:$true] %s218_s25 }
  0x15   :  { %v100_v5 = vld [vmem:[#allocation5 + $0x58] sm:$0xff]  ;;  %150 = vmatpush.msra.mxu1 %v145_v4  ;;  %v144_v6 = vld [vmem:[#allocation7 + $0x70] sm:$0xff]  ;;  %v143_v7 = vld [vmem:[#allocation7 + $0x68] sm:$0xff] }
  0x16   :  { %110 = vmatpush.msra.mxu0 %v103_v1  ;;  %v99_v8 = vld [vmem:[#allocation5 + $0x50] sm:$0xff]  ;;  %v142_v9 = vld [vmem:[#allocation7 + $0x60] sm:$0xff]  ;;  %v98_v10 = vld [vmem:[#allocation5 + $0x48] sm:$0xff] }
  0x17   :  { %151 = vmatpush.msra.mxu1 %v144_v6  ;;  %v141_v11 = vld [vmem:[#allocation7 + $0x58] sm:$0xff]  ;;  %v97_v12 = vld [vmem:[#allocation5 + $0x40] sm:$0xff]  ;;  %v140_v13 = vld [vmem:[#allocation7 + $0x50] sm:$0xff] }
  0x18   :  { %111 = vmatpush.msra.mxu0 %v102_v2  ;;  %v96_v14 = vld [vmem:[#allocation5 + $0x38] sm:$0xff]  ;;  %v139_v15 = vld [vmem:[#allocation7 + $0x48] sm:$0xff]  ;;  %v95_v16 = vld [vmem:[#allocation5 + $0x30] sm:$0xff] }
  0x19   :  { %152 = vmatpush.msra.mxu1 %v143_v7  ;;  %v138_v17 = vld [vmem:[#allocation7 + $0x40] sm:$0xff]  ;;  %v94_v18 = vld [vmem:[#allocation5 + $0x28] sm:$0xff]  ;;  %v137_v19 = vld [vmem:[#allocation7 + $0x38] sm:$0xff] }
  0x1a   :  { %112 = vmatpush.msra.mxu0 %v101_v3  ;;  %v93_v20 = vld [vmem:[#allocation5 + $0x20] sm:$0xff]  ;;  %v136_v21 = vld [vmem:[#allocation7 + $0x30] sm:$0xff]  ;;  %v92_v22 = vld [vmem:[#allocation5 + $0x18] sm:$0xff] }
  0x1b   :  { %153 = vmatpush.msra.mxu1 %v142_v9  ;;  %v135_v23 = vld [vmem:[#allocation7 + $0x28] sm:$0xff]  ;;  %v91_v24 = vld [vmem:[#allocation5 + $0x10] sm:$0xff]  ;;  %v134_v25 = vld [vmem:[#allocation7 + $0x20] sm:$0xff] }
  0x1c   :  { %113 = vmatpush.msra.mxu0 %v100_v5  ;;  %v90_v26 = vld [vmem:[#allocation5 + $0x8] sm:$0xff]  ;;  %v133_v27 = vld [vmem:[#allocation7 + $0x18] sm:$0xff]  ;;  %v89_v28 = vld [vmem:[#allocation5] sm:$0xff] }
  0x1d   :  { %154 = vmatpush.msra.mxu1 %v141_v11  ;;  %v88_v29 = vld [vmem:[#allocation2] sm:$0xff]  ;;  %v132_v30 = vld [vmem:[#allocation7 + $0x10] sm:$0xff]  ;;  %v131_v31 = vld [vmem:[#allocation7 + $0x8] sm:$0xff] }
  0x1e   :  { %114 = vmatpush.msra.mxu0 %v99_v8  ;;  %v130_v32 = vld [vmem:[#allocation7] sm:$0xff]  ;;  %v186_v33 = vld [vmem:[#allocation8 + $0x78] sm:$0xff]  ;;  %v185_v34 = vld [vmem:[#allocation8 + $0x70] sm:$0xff] }
  0x1f   :  { %155 = vmatpush.msra.mxu1 %v140_v13  ;;  %191 = vmatpush.msra.mxu2 %v186_v33  ;;  %v184_v35 = vld [vmem:[#allocation8 + $0x68] sm:$0xff]  ;;  %v183_v36 = vld [vmem:[#allocation8 + $0x60] sm:$0xff]  ;;  %v182_v37 = vld [vmem:[#allocation8 + $0x58] sm:$0xff] }
  0x20   :  { %115 = vmatpush.msra.mxu0 %v98_v10  ;;  %v181_v38 = vld [vmem:[#allocation8 + $0x50] sm:$0xff]  ;;  %v180_v39 = vld [vmem:[#allocation8 + $0x48] sm:$0xff]  ;;  %v179_v40 = vld [vmem:[#allocation8 + $0x40] sm:$0xff] }
  0x21   :  { %156 = vmatpush.msra.mxu1 %v139_v15  ;;  %192 = vmatpush.msra.mxu2 %v185_v34  ;;  %v178_v41 = vld [vmem:[#allocation8 + $0x38] sm:$0xff]  ;;  %v177_v42 = vld [vmem:[#allocation8 + $0x30] sm:$0xff]  ;;  %v176_v43 = vld [vmem:[#allocation8 + $0x28] sm:$0xff] }
  0x22   :  { %116 = vmatpush.msra.mxu0 %v97_v12  ;;  %v175_v44 = vld [vmem:[#allocation8 + $0x20] sm:$0xff]  ;;  %v174_v45 = vld [vmem:[#allocation8 + $0x18] sm:$0xff]  ;;  %v173_v50 = vld [vmem:[#allocation8 + $0x10] sm:$0xff] }
  0x23   :  { %157 = vmatpush.msra.mxu1 %v138_v17  ;;  %193 = vmatpush.msra.mxu2 %v184_v35  ;;  %v239_v46 = vld [vmem:[%s443_s2] ss:$0 sm:$0xff]  ;;  %v172_v51 = vld [vmem:[#allocation8 + $0x8] sm:$0xff]  ;;  %v171_v52 = vld [vmem:[#allocation8] sm:$0xff] }
  0x24   :  { %117 = vmatpush.msra.mxu0 %v96_v14  ;;  %v240_v53 = vld [vmem:[%s445_s4] ss:$0 sm:$0xff] }
  0x25   :  { %158 = vmatpush.msra.mxu1 %v137_v19  ;;  %194 = vmatpush.msra.mxu2 %v183_v36  ;;  %v241_v57 = vld [vmem:[%s447_s6] ss:$0 sm:$0xff] }
  0x26   :  { %118 = vmatpush.msra.mxu0 %v95_v16 }
  0x27   :  { %159 = vmatpush.msra.mxu1 %v136_v21  ;;  %195 = vmatpush.msra.mxu2 %v182_v37 }
  0x28   :  { %119 = vmatpush.msra.mxu0 %v94_v18 }
  0x29   :  { %160 = vmatpush.msra.mxu1 %v135_v23  ;;  %196 = vmatpush.msra.mxu2 %v181_v38 }
  0x2a   :  { %120 = vmatpush.msra.mxu0 %v93_v20 }
  0x2b   :  { %161 = vmatpush.msra.mxu1 %v134_v25  ;;  %197 = vmatpush.msra.mxu2 %v180_v39 }
  0x2c   :  { %121 = vmatpush.msra.mxu0 %v92_v22 }
  0x2d   :  { %162 = vmatpush.msra.mxu1 %v133_v27  ;;  %198 = vmatpush.msra.mxu2 %v179_v40 }
  0x2e   :  { %122 = vmatpush.msra.mxu0 %v91_v24 }
  0x2f   :  { %163 = vmatpush.msra.mxu1 %v132_v30  ;;  %199 = vmatpush.msra.mxu2 %v178_v41 }
  0x30   :  { %123 = vmatpush.msra.mxu0 %v90_v26 }
  0x31   :  { %164 = vmatpush.msra.mxu1 %v131_v31  ;;  %200 = vmatpush.msra.mxu2 %v177_v42 }
  0x32   :  { %124 = vmatpush.msra.mxu0 %v89_v28 }
  0x33   :  { %125 = vmatmul.f32.vlgmr.msra.gmra.mxu0 %v88_v29  ;;  %165 = vmatpush.msra.mxu1 %v130_v32 }
  0x34   :  { %201 = vmatpush.msra.mxu2 %v176_v43 }
  0x36   :  { %202 = vmatpush.msra.mxu2 %v175_v44 }
  0x38   :  { %203 = vmatpush.msra.mxu2 %v174_v45 }
  0x3a   :  { %204 = vmatpush.msra.mxu2 %v173_v50 }
  0x3c   :  { %205 = vmatpush.msra.mxu2 %v172_v51 }
  0x3e   :  { %206 = vmatpush.msra.mxu2 %v171_v52 }
  0xb0   :  { %v126_v47 = vpop.f32.mrf.mxu0 }
  0xb1   :  { %v127_v48 = vadd.f32 %v239_v46, %v126_v47 }
  0xb3   :  { %v129_v49 = vmax.f32 %v127_v48, 0.0 }
  0xb5   :  { %166 = vmatmul.f32.vlgmr.msra.gmra.mxu1 %v129_v49 }
 0x132   :  { %v167_v54 = vpop.f32.mrf.mxu1 }
 0x133   :  { %v168_v55 = vadd.f32 %v240_v53, %v167_v54 }
 0x135   :  { %v170_v56 = vmax.f32 %v168_v55, 0.0 }
 0x137   :  { %207 = vmatmul.f32.vlgmr.msra.gmra.mxu2 %v170_v56 }
 0x1ba   :  { %v208_v58 = vpop.f32.mrf.mxu2 }
 0x1bb   :  { %v209_v59 = vadd.f32 %v241_v57, %v208_v58 }
 0x1bd   :  { %v211_v60 = vmax.f32 %v209_v59, 0.0 }
 0x1bf   :  { %212 = vst [vmem:[#allocation10] sm:$0xff] %v211_v60 }
 0x1c0   :  { %223 = dma.vmem_to_hbm [thread:$0]  %s219_s25, 128, %s221_s28, [#allocation4]  }
 0x1c1   :  { %368 = dma.done.wait [#allocation4], 128  }
 0x1c2   :  { %369 = vsyncadd [#allocation4], 4294967168 }
 0x1c3   :  { %228 = vsyncpa [#allocation3], 1 }
 0x1c4   :  { %229 = vsyncpa [#allocation6], 1 }
 0x1c5   :  { %230 = vsyncpa [#allocation9], 1 }
 0x1c6   :  { %231 = vsyncpa [#allocation4], 1 }

</bundles_post_ra>
